<compile_context>
chip_gen: v5e
topology: v5e:2x2
jax: 0.10.0
libtpu: 0.0.40
codegen_flags: <defaults>
</compile_context>

<pallas_src>
import functools

import jax
import jax.numpy as jnp
import numpy as np
from jax.experimental import pallas as pl
from jax.experimental.pallas import tpu as pltpu

EPS = 1e-5                       # PyTorch BatchNorm2d default eps
DILATIONS = (6, 12, 18)
PAD = max(DILATIONS)             # halo padding on each side of the image
_OFF_TAPS = tuple((ky, kx) for ky in (-1, 0, 1) for kx in (-1, 0, 1)
                  if not (ky == 0 and kx == 0))          # 8 off-centre 3x3 taps
NUM_TAPS = 1 + len(_OFF_TAPS) * len(DILATIONS)           # 25 unique taps


# --------------------------------------------------------------------------- kernel

def _aspp_fused_kernel(lhs_ref, rhs_ref, pool_ref, o_ref, *, Cout):
    """One grid step = one pixel tile of one batch element, all five ASPP branches.

    lhs_ref  : (tile, K)        im2col rows: 25 taps x Cin + ones column, zero padded
    rhs_ref  : (K, 4*Cout)      BN/bias folded weights + shift row (shared, lane dense)
    pool_ref : (1, Cout)        pooled -> conv -> BN -> ReLU vector of this batch elem
    o_ref    : (tile, 5*Cout)
    """
    acc = jnp.dot(lhs_ref[...], rhs_ref[...], preferred_element_type=jnp.float32)
    # branches 1-4: single relu epilogue, one wide lane-dense store
    o_ref[:, 0:4 * Cout] = jnp.maximum(acc, 0.0).astype(o_ref.dtype)
    # branch 5 (global pool): bilinear upsample of a 1x1 map, align_corners=True == splat
    o_ref[:, 4 * Cout:5 * Cout] = jnp.broadcast_to(
        pool_ref[...], (o_ref.shape[0], Cout)).astype(o_ref.dtype)


# --------------------------------------------------------------------------- wrapper

def _fold_bn(p):
    """Fold eval-mode BatchNorm (and the conv bias) into (scale, shift)."""
    scale = p["gamma"] / jnp.sqrt(p["var"] + EPS)
    shift = scale * p["b"] + p["beta"] - p["mean"] * scale
    return scale, shift


@functools.partial(jax.jit, static_argnames=("compute_dtype",))
def aspp_forward(x_nchw, params, compute_dtype=jnp.bfloat16):
    """ASPP forward. Input NCHW, output NCHW (N, 5*out_channels, H, W), f32."""
    x_f32 = jnp.transpose(x_nchw, (0, 2, 3, 1)).astype(jnp.float32)   # NHWC
    N, H, W, Cin = x_f32.shape
    Cout = params["c1x1_1"]["w"].shape[0]

    ones_row = NUM_TAPS * Cin                   # index of ones column / shift row
    K = ((ones_row + 1 + 127) // 128) * 128     # lane-dense contraction dim

    # ---- RHS: fold bias + BN into weights; shift folded via the ones row ------------
    rhs = jnp.zeros((K, 4 * Cout), jnp.float32)

    s1, sh1 = _fold_bn(params["c1x1_1"])
    w1 = params["c1x1_1"]["w"].reshape(Cout, Cin).T * s1[None, :]          # (Cin, Cout)
    rhs = rhs.at[0:Cin, 0:Cout].set(w1)
    rhs = rhs.at[ones_row, 0:Cout].set(sh1)

    for d_idx, nm in enumerate(("c3x3_1", "c3x3_2", "c3x3_3")):
        s, sh = _fold_bn(params[nm])
        w = params[nm]["w"]                                                # (Cout,Cin,3,3)
        cs = (1 + d_idx) * Cout
        rhs = rhs.at[0:Cin, cs:cs + Cout].set(w[:, :, 1, 1].T * s[None, :])   # centre tap
        for t, (ky, kx) in enumerate(_OFF_TAPS):
            r0 = Cin * (1 + 8 * d_idx + t)
            rhs = rhs.at[r0:r0 + Cin, cs:cs + Cout].set(
                w[:, :, ky + 1, kx + 1].T * s[None, :])
        rhs = rhs.at[ones_row, cs:cs + Cout].set(sh)
    rhs = rhs.astype(compute_dtype)

    # ---- global-pool branch: tiny (N,Cin)@(Cin,Cout) projection in f32 glue ---------
    sp, shp = _fold_bn(params["c1x1_2"])
    wp = params["c1x1_2"]["w"].reshape(Cout, Cin).T * sp[None, :]
    pool_vec = jnp.maximum(jnp.mean(x_f32, axis=(1, 2)) @ wp + shp[None, :], 0.0)
    pool_vec = pool_vec.reshape(N, 1, Cout).astype(jnp.float32)

    # ---- lane-dense im2col LHS: 25 unique taps x Cin + ones column, padded to K -----
    xp = jnp.pad(x_f32, ((0, 0), (PAD, PAD), (PAD, PAD), (0, 0)))
    tap_offsets = [(0, 0)] + [(ky * d, kx * d)
                              for d in DILATIONS for (ky, kx) in _OFF_TAPS]
    cols = [xp[:, PAD + dy:PAD + dy + H, PAD + dx:PAD + dx + W, :]
            for (dy, dx) in tap_offsets]
    lhs = jnp.concatenate(cols + [jnp.ones((N, H, W, 1), jnp.float32)], axis=-1)
    lhs = jnp.pad(lhs, ((0, 0), (0, 0), (0, 0), (0, K - (ones_row + 1))))
    lhs = lhs.reshape(N, H * W, K).astype(compute_dtype)

    # ---- grid: whole image per step; power-of-two row-tiling fallback for VMEM ------
    itemsize = jnp.dtype(compute_dtype).itemsize

    def step_bytes(rows):        # double-buffered lhs + out tiles, resident rhs
        return (2 * rows * W * (K + 5 * Cout) + K * 4 * Cout) * itemsize

    rows_per_tile = H
    while rows_per_tile % 2 == 0 and step_bytes(rows_per_tile) > (8 << 20):
        rows_per_tile //= 2
    if (rows_per_tile * W) % 8 != 0:             # keep blocks sublane aligned
        rows_per_tile = H
    tile = rows_per_tile * W
    grid = (N, (H * W) // tile)

    kern = functools.partial(_aspp_fused_kernel, Cout=Cout)
    out = pl.pallas_call(
        kern,
        out_shape=jax.ShapeDtypeStruct((N, H * W, 5 * Cout), compute_dtype),
        grid=grid,
        in_specs=[
            pl.BlockSpec((None, tile, K), lambda n, t: (n, t, 0)),        # im2col LHS
            pl.BlockSpec((K, 4 * Cout), lambda n, t: (0, 0)),             # fused weights
            pl.BlockSpec((None, 1, Cout), lambda n, t: (n, 0, 0)),        # pool vector
        ],
        out_specs=pl.BlockSpec((None, tile, 5 * Cout), lambda n, t: (n, t, 0)),
        compiler_params=pltpu.CompilerParams(
            dimension_semantics=("parallel", "parallel"),
            vmem_limit_bytes=32 * 1024 * 1024),
    )(lhs, rhs, pool_vec)

    out = out.reshape(N, H, W, 5 * Cout)
    # TODO(synk): return channels-last / bf16 directly when the consumer accepts it; the
    # NCHW f32 relayout below exists only to match the PyTorch interface.
    return jnp.transpose(out, (0, 3, 1, 2)).astype(jnp.float32)


# --------------------------------------------------------------------------- params

def init_aspp_params(key, in_channels, out_channels):
    """Deterministic synthetic parameters (PyTorch layouts: conv weight OIHW)."""
    names = ["c1x1_1", "c3x3_1", "c3x3_2", "c3x3_3", "c1x1_2"]
    ksizes = [1, 3, 3, 3, 1]
    keys = jax.random.split(key, 6 * len(names))
    P = {}
    for i, (nm, ks) in enumerate(zip(names, ksizes)):
        k = keys[6 * i:6 * i + 6]
        P[nm] = dict(
            w=jax.random.normal(k[0], (out_channels, in_channels, ks, ks), jnp.float32) * 0.1,
            b=jax.random.normal(k[1], (out_channels,), jnp.float32) * 0.1,
            gamma=1.0 + 0.1 * jax.random.normal(k[2], (out_channels,), jnp.float32),
            beta=0.1 * jax.random.normal(k[3], (out_channels,), jnp.float32),
            mean=0.1 * jax.random.normal(k[4], (out_channels,), jnp.float32),
            var=jax.random.uniform(k[5], (out_channels,), jnp.float32, minval=0.5, maxval=1.5),
        )
    return P


# --------------------------------------------------------------------------- reference

def reference_aspp(x_nchw, P):
    def bn(y, p):
        c = lambda a: a[None, :, None, None]
        return (y - c(p["mean"])) / jnp.sqrt(c(p["var"]) + EPS) * c(p["gamma"]) + c(p["beta"])

    def conv(x, p, dil, pad):
        y = jax.lax.conv_general_dilated(
            x, p["w"], (1, 1), ((pad, pad), (pad, pad)),
            rhs_dilation=(dil, dil), dimension_numbers=("NCHW", "OIHW", "NCHW"))
        return y + p["b"][None, :, None, None]

    out1 = jax.nn.relu(bn(conv(x_nchw, P["c1x1_1"], 1, 0), P["c1x1_1"]))
    out2 = jax.nn.relu(bn(conv(x_nchw, P["c3x3_1"], 6, 6), P["c3x3_1"]))
    out3 = jax.nn.relu(bn(conv(x_nchw, P["c3x3_2"], 12, 12), P["c3x3_2"]))
    out4 = jax.nn.relu(bn(conv(x_nchw, P["c3x3_3"], 18, 18), P["c3x3_3"]))
    pooled = jnp.mean(x_nchw, axis=(2, 3), keepdims=True)
    out5 = jax.nn.relu(bn(conv(pooled, P["c1x1_2"], 1, 0), P["c1x1_2"]))
    out5 = jnp.broadcast_to(out5, out1.shape)   # bilinear from 1x1, align_corners=True
    return jnp.concatenate([out1, out2, out3, out4, out5], axis=1)


# --------------------------------------------------------------------------- main

if __name__ == "__main__":
    IN_CH, OUT_CH, N, H, W = 4, 128, 2, 16, 16

    key = jax.random.PRNGKey(0)
    kx, kp = jax.random.split(key)
    x = jax.random.normal(kx, (N, IN_CH, H, W), jnp.float32)
    params = init_aspp_params(kp, IN_CH, OUT_CH)

    ref = jax.block_until_ready(reference_aspp(x, params))

    # strict validation in f32
    out_f32 = jax.block_until_ready(aspp_forward(x, params, compute_dtype=jnp.float32))
    assert out_f32.shape == (N, 5 * OUT_CH, H, W), out_f32.shape
    np.testing.assert_allclose(np.asarray(out_f32), np.asarray(ref), atol=2e-4, rtol=2e-4)

    # bf16 activations/weights/output (MXU-native), f32 accumulation: looser tolerance
    out_bf16 = jax.block_until_ready(aspp_forward(x, params, compute_dtype=jnp.bfloat16))
    np.testing.assert_allclose(np.asarray(out_bf16), np.asarray(ref), atol=5e-2, rtol=5e-2)

    print("KERNEL_OK")
</pallas_src>

<mosaic_0001>
module attributes {stable_mosaic.version = 11 : i64} {
  func.func @_aspp_fused_kernel(%arg0: i32, %arg1: i32, %arg2: memref<1x256x128xf32, #tpu.memory_space<vmem>>, %arg3: memref<128x512xf32, #tpu.memory_space<vmem>>, %arg4: memref<1x1x128xf32, #tpu.memory_space<vmem>>, %arg5: memref<1x256x640xf32, #tpu.memory_space<vmem>>) attributes {dimension_semantics = [#tpu.dimension_semantics<parallel>, #tpu.dimension_semantics<parallel>], iteration_bounds = array<i64: 2, 1>, scalar_prefetch = 0 : i64, scratch_operands = 0 : i64, tpu.core_type = #tpu.core_type<tc>, window_params = [{transform_indices = @transform_0, window_bounds = array<i64: 1, 256, 128>}, {pipeline_mode = #tpu.pipeline_mode<synchronous>, transform_indices = @transform_1, window_bounds = array<i64: 128, 512>}, {transform_indices = @transform_2, window_bounds = array<i64: 1, 1, 128>}, {transform_indices = @transform_3, window_bounds = array<i64: 1, 256, 640>}]} {
    %c0 = arith.constant 0 : index
    %c0_0 = arith.constant 0 : index
    %c0_1 = arith.constant 0 : index
    %0 = vector.load %arg2[%c0, %c0_0, %c0_1] : memref<1x256x128xf32, #tpu.memory_space<vmem>>, vector<1x256x128xf32>
    %1 = vector.shape_cast %0 : vector<1x256x128xf32> to vector<256x128xf32>
    %c0_2 = arith.constant 0 : index
    %c0_3 = arith.constant 0 : index
    %2 = vector.load %arg3[%c0_2, %c0_3] : memref<128x512xf32, #tpu.memory_space<vmem>>, vector<128x512xf32>
    %cst = arith.constant dense<0.000000e+00> : vector<256x512xf32>
    %3 = tpu.matmul %1, %2, %cst {dimension_numbers = #tpu.dot_dimension_numbers<[1], [0], [0], [1], [0, 0, 1, 1], [], []>} : vector<256x128xf32>, vector<128x512xf32>, vector<256x512xf32> -> vector<256x512xf32>
    %cst_4 = arith.constant 0.000000e+00 : f32
    %4 = vector.broadcast %cst_4 : f32 to vector<256x512xf32>
    %5 = arith.maximumf %3, %4 : vector<256x512xf32>
    %c0_5 = arith.constant 0 : index
    %c0_6 = arith.constant 0 : index
    %c0_7 = arith.constant 0 : index
    %6 = vector.load %arg5[%c0_5, %c0_6, %c0_7] : memref<1x256x640xf32, #tpu.memory_space<vmem>>, vector<1x256x512xf32>
    %7 = vector.shape_cast %6 : vector<1x256x512xf32> to vector<256x512xf32>
    %8 = vector.shape_cast %5 : vector<256x512xf32> to vector<1x256x512xf32>
    tpu.vector_store %arg5[%c0_5, %c0_6, %c0_7], %8 {strides = array<i32>} : memref<1x256x640xf32, #tpu.memory_space<vmem>>, vector<1x256x512xf32>,
    %c0_8 = arith.constant 0 : index
    %c0_9 = arith.constant 0 : index
    %c0_10 = arith.constant 0 : index
    %9 = vector.load %arg4[%c0_8, %c0_9, %c0_10] : memref<1x1x128xf32, #tpu.memory_space<vmem>>, vector<1x1x128xf32>
    %10 = vector.shape_cast %9 : vector<1x1x128xf32> to vector<1x128xf32>
    %11 = vector.shape_cast %10 : vector<1x128xf32> to vector<1x128xf32>
    %12 = vector.broadcast %11 : vector<1x128xf32> to vector<256x128xf32>
    %c0_11 = arith.constant 0 : index
    %c0_12 = arith.constant 0 : index
    %c512 = arith.constant 512 : index
    %13 = vector.load %arg5[%c0_11, %c0_12, %c512] : memref<1x256x640xf32, #tpu.memory_space<vmem>>, vector<1x256x128xf32>
    %14 = vector.shape_cast %13 : vector<1x256x128xf32> to vector<256x128xf32>
    %15 = vector.shape_cast %12 : vector<256x128xf32> to vector<1x256x128xf32>
    tpu.vector_store %arg5[%c0_11, %c0_12, %c512], %15 {strides = array<i32>} : memref<1x256x640xf32, #tpu.memory_space<vmem>>, vector<1x256x128xf32>,
    return
  }
  func.func @transform_0(%arg0: i32, %arg1: i32) -> (i32, i32, i32) {
    %c0_i32 = arith.constant 0 : i32
    %c0_i32_0 = arith.constant 0 : i32
    return %arg0, %arg1, %c0_i32 : i32, i32, i32
  }
  func.func @transform_1(%arg0: i32, %arg1: i32) -> (i32, i32) {
    %c0_i32 = arith.constant 0 : i32
    %c0_i32_0 = arith.constant 0 : i32
    %c0_i32_1 = arith.constant 0 : i32
    return %c0_i32, %c0_i32_0 : i32, i32
  }
  func.func @transform_2(%arg0: i32, %arg1: i32) -> (i32, i32, i32) {
    %c0_i32 = arith.constant 0 : i32
    %c0_i32_0 = arith.constant 0 : i32
    %c0_i32_1 = arith.constant 0 : i32
    return %arg0, %c0_i32, %c0_i32_0 : i32, i32, i32
  }
  func.func @transform_3(%arg0: i32, %arg1: i32) -> (i32, i32, i32) {
    %c0_i32 = arith.constant 0 : i32
    %c0_i32_0 = arith.constant 0 : i32
    return %arg0, %arg1, %c0_i32 : i32, i32, i32
  }
}

</mosaic_0001>

<bundles_post_ra>
// kernel: aspp_forward.1
= control target key start
LH: loop header
LB: loop body
LE: loop exit
PB: predicated region body
PF: predicated region fallthrough
CT: control target
= control target key end

     0   :  { %8 = vsyncpa [#allocation3], 0  ;;  %s1838_s0 = inlined_call_operand.vmem [shape: f32[2,256,128], index: 0, kind: input, shape index: {}]   ;;  %s1839_s1 = inlined_call_operand.vmem [shape: f32[128,512], index: 1, kind: input, shape index: {}]   ;;  %s1840_s2 = inlined_call_operand.vmem [shape: f32[2,1,128], index: 2, kind: input, shape index: {}]   ;;  %s1841_s3 = inlined_call_operand.hbm [shape: f32[2,256,640], index: 3, kind: output, shape index: {}]  }
   0x1   :  { %10 = vsyncpa [#allocation3 + $0x1], 0  ;;  %s1334_s12 = smov 0   ;;  %s1336_s13 = smov 0  }
   0x2   :  { %s1338_s14 = smov 0   ;;  %s1340_s15 = smov 0  }
   0x3   :  { %s1342_s16 = smov 0   ;;  %s1344_s17 = smov 0  }
   0x4 LB: > { %s1161_s18 = sadd.s32 4294967295, %s1310_s17   ;;  %s1162_s19 = sadd.s32 4294967294, %s1310_s17   ;;  %s1310_s17 = sphi %s1344_s17, %s16_s17   ;;  %s1306_s16 = sphi %s1342_s16, %s1848_s16   ;;  %s1302_s15 = sphi %s1340_s15, %s1847_s15   ;;  %s1298_s14 = sphi %s1338_s14, %s1846_s14   ;;  %s1294_s13 = sphi %s1336_s13, %s1845_s13   ;;  %s1290_s12 = sphi %s1334_s12, %s1844_s12  }
   0x5   : > { %s28_s20 = sadd.s32 1, %s1306_s16  ;;  %s112_s21 = sadd.s32 1, %s1298_s14 }
   0x6   : > { %p30_p0 = scmp.ge.s32.totalorder %s28_s20, 2  ;;  %p122_p1 = scmp.ne.s32.totalorder %s1298_s14, %s1294_s13 }
   0x7   : > { %p123_p2 = scmp.eq.s32.totalorder %s1161_s18, 1  ;;  %p128_p3 = scmp.ne.s32.totalorder %s1294_s13, %s1290_s12 }
   0x8   : > { %s1850_s20 = smov (%p30_p0, %s28_s20), 0  ;;  %p129_p5 = scmp.eq.s32.totalorder %s1162_s19, 1 }
   0x9   : > { %p1374_p4 = por %p123_p2, %p122_p1  ;;  %s107_s23 = ssub.s32 %s1306_s16, %s1850_s20 }
   0xa   : > { %p1165_p6 = scmp.ge.s32.totalorder %s1310_s17, 1  ;;  %p110_p7 = scmp.eq.s32.totalorder %s107_s23, 0 }
   0xb   : > { %p1381_p8 = por %p129_p5, %p128_p3  ;;  %p169_p9 = scmp.lt.s32.totalorder %s1310_s17, 3 }
   0xc   : > { %s1387_s25 = scalar_select %p110_p7, %s1298_s14, %s112_s21  }
   0xd   : > { %p170_p10 = pnand %p1165_p6, %p169_p9 }
   0xe   : > { %p201_p11 = scmp.lt.s32.totalorder (!%p170_p10), %s1302_s15, 1  ;;  %s197_s10 = sand.u32 (!%p170_p10), 1, %s1294_s13  }
   0xf   : > { %173 = sbr.rel (%p170_p10) target bundleno = 439 (0x1b7), region = 32  ;;  %s1055_s23 = scalar_lea.sflag (!%p170_p10), [#allocation3], %s197_s10 }
  0x10   : > { %s1172_s11 = smul.u32 (!%p170_p10), 1280, %s197_s10  ;;  %s1252_s6 = scalar_lea.hbm (!%p170_p10), %s1841_s3, 2560 }
  0x14   : > { %v308_v0 = vld [vmem:[%s1839_s1 + $0x1f0] sm:$0xff]  ;;  %v309_v1 = vld [vmem:[%s1839_s1 + $0x1f8] sm:$0xff]  ;;  %v306_v6 = vld [vmem:[%s1839_s1 + $0x1e0] sm:$0xff]  ;;  %s1501_s30 = scalar_select %p201_p11, %s1302_s15, 1 }
  0x15   : > { %v304_v2 = vld [vmem:[%s1839_s1 + $0x1d0] sm:$0xff]  ;;  %536 = vmatpush.msra.mxu2 %v308_v0  ;;  %649 = vmatpush.msra.mxu3 %v309_v1  ;;  %v305_v3 = vld [vmem:[%s1839_s1 + $0x1d8] sm:$0xff]  ;;  %v307_v7 = vld [vmem:[%s1839_s1 + $0x1e8] sm:$0xff] }
  0x16   : > { %v300_v4 = vld [vmem:[%s1839_s1 + $0x1b0] sm:$0xff]  ;;  %v301_v5 = vld [vmem:[%s1839_s1 + $0x1b8] sm:$0xff]  ;;  %v302_v8 = vld [vmem:[%s1839_s1 + $0x1c0] sm:$0xff]  ;;  %310 = vmatpush.msra.mxu0 %v306_v6  ;;  %423 = vmatpush.msra.mxu1 %v307_v7  ;;  %s212_s21 = scalar_lea.vmem %s1840_s2, %s1501_s30  ;;  %s1171_s4 = sshll.u32 %s1501_s30, 8 }
  0x17   : > { %537 = vmatpush.msra.mxu2 %v304_v2  ;;  %650 = vmatpush.msra.mxu3 %v305_v3  ;;  %v303_v9 = vld [vmem:[%s1839_s1 + $0x1c8] sm:$0xff]  ;;  %v296_v10 = vld [vmem:[%s1839_s1 + $0x190] sm:$0xff]  ;;  %v297_v11 = vld [vmem:[%s1839_s1 + $0x198] sm:$0xff]  ;;  %s1571_s5 = scalar_lea.vmem %s1838_s0, %s1171_s4  ;;  %s1606_s30 = scalar_lea.vmem [#allocation2], %s1172_s11 }
  0x18   : > { %v298_v12 = vld [vmem:[%s1839_s1 + $0x1a0] sm:$0xff]  ;;  %v299_v13 = vld [vmem:[%s1839_s1 + $0x1a8] sm:$0xff]  ;;  %311 = vmatpush.msra.mxu0 %v302_v8  ;;  %424 = vmatpush.msra.mxu1 %v303_v9  ;;  %v292_v14 = vld [vmem:[%s1839_s1 + $0x170] sm:$0xff] }
  0x19   : > { %538 = vmatpush.msra.mxu2 %v300_v4  ;;  %651 = vmatpush.msra.mxu3 %v301_v5  ;;  %v293_v15 = vld [vmem:[%s1839_s1 + $0x178] sm:$0xff]  ;;  %v294_v16 = vld [vmem:[%s1839_s1 + $0x180] sm:$0xff]  ;;  %v295_v17 = vld [vmem:[%s1839_s1 + $0x188] sm:$0xff] }
  0x1a   : > { %312 = vmatpush.msra.mxu0 %v298_v12  ;;  %425 = vmatpush.msra.mxu1 %v299_v13  ;;  %v288_v18 = vld [vmem:[%s1839_s1 + $0x150] sm:$0xff]  ;;  %v289_v19 = vld [vmem:[%s1839_s1 + $0x158] sm:$0xff]  ;;  %v290_v20 = vld [vmem:[%s1839_s1 + $0x160] sm:$0xff] }
  0x1b   : > { %539 = vmatpush.msra.mxu2 %v296_v10  ;;  %652 = vmatpush.msra.mxu3 %v297_v11  ;;  %v291_v21 = vld [vmem:[%s1839_s1 + $0x168] sm:$0xff]  ;;  %v284_v22 = vld [vmem:[%s1839_s1 + $0x130] sm:$0xff]  ;;  %v285_v23 = vld [vmem:[%s1839_s1 + $0x138] sm:$0xff] }
  0x1c   : > { %313 = vmatpush.msra.mxu0 %v294_v16  ;;  %426 = vmatpush.msra.mxu1 %v295_v17  ;;  %v286_v24 = vld [vmem:[%s1839_s1 + $0x140] sm:$0xff]  ;;  %v287_v25 = vld [vmem:[%s1839_s1 + $0x148] sm:$0xff]  ;;  %v280_v26 = vld [vmem:[%s1839_s1 + $0x110] sm:$0xff] }
  0x1d   : > { %540 = vmatpush.msra.mxu2 %v292_v14  ;;  %653 = vmatpush.msra.mxu3 %v293_v15  ;;  %v281_v27 = vld [vmem:[%s1839_s1 + $0x118] sm:$0xff]  ;;  %v282_v28 = vld [vmem:[%s1839_s1 + $0x120] sm:$0xff]  ;;  %v283_v29 = vld [vmem:[%s1839_s1 + $0x128] sm:$0xff] }
  0x1e   : > { %314 = vmatpush.msra.mxu0 %v290_v20  ;;  %427 = vmatpush.msra.mxu1 %v291_v21  ;;  %v276_v30 = vld [vmem:[%s1839_s1 + $0xf0] sm:$0xff]  ;;  %v277_v31 = vld [vmem:[%s1839_s1 + $0xf8] sm:$0xff]  ;;  %v278_v32 = vld [vmem:[%s1839_s1 + $0x100] sm:$0xff] }
  0x1f   : > { %541 = vmatpush.msra.mxu2 %v288_v18  ;;  %654 = vmatpush.msra.mxu3 %v289_v19  ;;  %v279_v33 = vld [vmem:[%s1839_s1 + $0x108] sm:$0xff]  ;;  %v272_v34 = vld [vmem:[%s1839_s1 + $0xd0] sm:$0xff]  ;;  %v273_v35 = vld [vmem:[%s1839_s1 + $0xd8] sm:$0xff] }
  0x20   : > { %315 = vmatpush.msra.mxu0 %v286_v24  ;;  %428 = vmatpush.msra.mxu1 %v287_v25  ;;  %v274_v36 = vld [vmem:[%s1839_s1 + $0xe0] sm:$0xff]  ;;  %v275_v37 = vld [vmem:[%s1839_s1 + $0xe8] sm:$0xff]  ;;  %v268_v38 = vld [vmem:[%s1839_s1 + $0xb0] sm:$0xff] }
  0x21   : > { %542 = vmatpush.msra.mxu2 %v284_v22  ;;  %655 = vmatpush.msra.mxu3 %v285_v23  ;;  %v269_v39 = vld [vmem:[%s1839_s1 + $0xb8] sm:$0xff]  ;;  %v270_v40 = vld [vmem:[%s1839_s1 + $0xc0] sm:$0xff]  ;;  %v271_v41 = vld [vmem:[%s1839_s1 + $0xc8] sm:$0xff] }
  0x22   : > { %316 = vmatpush.msra.mxu0 %v282_v28  ;;  %429 = vmatpush.msra.mxu1 %v283_v29  ;;  %v264_v42 = vld [vmem:[%s1839_s1 + $0x90] sm:$0xff]  ;;  %v265_v43 = vld [vmem:[%s1839_s1 + $0x98] sm:$0xff]  ;;  %v266_v44 = vld [vmem:[%s1839_s1 + $0xa0] sm:$0xff] }
  0x23   : > { %543 = vmatpush.msra.mxu2 %v280_v26  ;;  %656 = vmatpush.msra.mxu3 %v281_v27  ;;  %v267_v45 = vld [vmem:[%s1839_s1 + $0xa8] sm:$0xff]  ;;  %v260_v46 = vld [vmem:[%s1839_s1 + $0x70] sm:$0xff]  ;;  %v261_v47 = vld [vmem:[%s1839_s1 + $0x78] sm:$0xff] }
  0x24   : > { %317 = vmatpush.msra.mxu0 %v278_v32  ;;  %430 = vmatpush.msra.mxu1 %v279_v33  ;;  %v262_v48 = vld [vmem:[%s1839_s1 + $0x80] sm:$0xff]  ;;  %v263_v49 = vld [vmem:[%s1839_s1 + $0x88] sm:$0xff]  ;;  %v256_v50 = vld [vmem:[%s1839_s1 + $0x50] sm:$0xff] }
  0x25   : > { %544 = vmatpush.msra.mxu2 %v276_v30  ;;  %657 = vmatpush.msra.mxu3 %v277_v31  ;;  %v257_v51 = vld [vmem:[%s1839_s1 + $0x58] sm:$0xff]  ;;  %v258_v52 = vld [vmem:[%s1839_s1 + $0x60] sm:$0xff]  ;;  %v259_v53 = vld [vmem:[%s1839_s1 + $0x68] sm:$0xff] }
  0x26   : > { %318 = vmatpush.msra.mxu0 %v274_v36  ;;  %431 = vmatpush.msra.mxu1 %v275_v37  ;;  %v252_v54 = vld [vmem:[%s1839_s1 + $0x30] sm:$0xff]  ;;  %v253_v55 = vld [vmem:[%s1839_s1 + $0x38] sm:$0xff]  ;;  %v254_v56 = vld [vmem:[%s1839_s1 + $0x40] sm:$0xff] }
  0x27   : > { %545 = vmatpush.msra.mxu2 %v272_v34  ;;  %658 = vmatpush.msra.mxu3 %v273_v35  ;;  %v255_v57 = vld [vmem:[%s1839_s1 + $0x48] sm:$0xff]  ;;  %v248_v58 = vld [vmem:[%s1839_s1 + $0x10] sm:$0xff]  ;;  %v249_v59 = vld [vmem:[%s1839_s1 + $0x18] sm:$0xff] }
  0x28   : > { %319 = vmatpush.msra.mxu0 %v270_v40  ;;  %432 = vmatpush.msra.mxu1 %v271_v41  ;;  %v214_v60 = vld [vmem:[%s1571_s5] sm:$0xff]  ;;  %v251_v62 = vld [vmem:[%s1839_s1 + $0x28] sm:$0xff]  ;;  %v216_v3 = vld [vmem:[%s1571_s5 + $0x10] sm:$0xff] }
  0x29   : > { %546 = vmatpush.msra.mxu2 %v268_v38  ;;  %659 = vmatpush.msra.mxu3 %v269_v39  ;;  %v250_v61 = vld [vmem:[%s1839_s1 + $0x20] sm:$0xff]  ;;  %v247_v1 = vld [vmem:[%s1839_s1 + $0x8] sm:$0xff]  ;;  %v217_v4 = vld [vmem:[%s1571_s5 + $0x18] sm:$0xff] }
  0x2a   : > { %320 = vmatpush.msra.mxu0 %v266_v44  ;;  %433 = vmatpush.msra.mxu1 %v267_v45  ;;  %v1231_v63 = vld [vmem:[%s212_s21] ss:$0 sm:$0xff]  ;;  %v215_v2 = vld [vmem:[%s1571_s5 + $0x8] sm:$0xff]  ;;  %v220_v7 = vld [vmem:[%s1571_s5 + $0x30] sm:$0xff]  ;;  %s1173_s21 = smul.u32 1280, %s1302_s15  ;;  %s1070_s15 = sshll.u32 %s1606_s30, 4  ;;  %s1071_s15 = int_to_ptr.vmem [resolvable:$true] %s1070_s15 }
  0x2b   : > { %547 = vmatpush.msra.mxu2 %v264_v42  ;;  %660 = vmatpush.msra.mxu3 %v265_v43  ;;  %v246_v0 = vld [vmem:[%s1839_s1] sm:$0xff]  ;;  %1022 = vst [vmem:[%s1606_s30 + $0x20] sm:$0xff] %v1231_v63  ;;  %v219_v6 = vld [vmem:[%s1571_s5 + $0x28] sm:$0xff]  ;;  %v221_v8 = vld [vmem:[%s1571_s5 + $0x38] sm:$0xff] }
  0x2c   : > { %321 = vmatpush.msra.mxu0 %v262_v48  ;;  %434 = vmatpush.msra.mxu1 %v263_v49  ;;  %1023 = vst [vmem:[%s1606_s30 + $0x48] sm:$0xff] %v1231_v63  ;;  %v218_v5 = vld [vmem:[%s1571_s5 + $0x20] sm:$0xff]  ;;  %v223_v10 = vld [vmem:[%s1571_s5 + $0x48] sm:$0xff]  ;;  %v224_v11 = vld [vmem:[%s1571_s5 + $0x50] sm:$0xff]  ;;  %s1069_s18 = scalar_lea.hbm %s1841_s3, %s1173_s21 }
  0x2d   : > { %548 = vmatpush.msra.mxu2 %v260_v46  ;;  %661 = vmatpush.msra.mxu3 %v261_v47  ;;  %1024 = vst [vmem:[%s1606_s30 + $0x70] sm:$0xff] %v1231_v63  ;;  %v222_v9 = vld [vmem:[%s1571_s5 + $0x40] sm:$0xff]  ;;  %v225_v12 = vld [vmem:[%s1571_s5 + $0x58] sm:$0xff]  ;;  %v227_v14 = vld [vmem:[%s1571_s5 + $0x68] sm:$0xff]  ;;  %s1072_s19 = sshll.u32 %s1069_s18, 4  ;;  %s1073_s19 = int_to_ptr.hbm [resolvable:$true] %s1072_s19 }
  0x2e   : > { %322 = vmatpush.msra.mxu0 %v258_v52  ;;  %435 = vmatpush.msra.mxu1 %v259_v53  ;;  %1025 = vst [vmem:[%s1606_s30 + $0x98] sm:$0xff] %v1231_v63  ;;  %v226_v13 = vld [vmem:[%s1571_s5 + $0x60] sm:$0xff]  ;;  %v228_v15 = vld [vmem:[%s1571_s5 + $0x70] sm:$0xff]  ;;  %v229_v16 = vld [vmem:[%s1571_s5 + $0x78] sm:$0xff]  ;;  %s1246_s26 = sshra.s32 %s1073_s19, 4  ;;  %s1247_s26 = int_to_ptr.hbm [resolvable:$true] %s1246_s26 }
  0x2f   : > { %549 = vmatpush.msra.mxu2 %v256_v50  ;;  %662 = vmatpush.msra.mxu3 %v257_v51  ;;  %1026 = vst [vmem:[%s1606_s30 + $0xc0] sm:$0xff] %v1231_v63  ;;  %v230_v17 = vld [vmem:[%s1571_s5 + $0x80] sm:$0xff]  ;;  %v231_v26 = vld [vmem:[%s1571_s5 + $0x88] sm:$0xff]  ;;  %v232_v35 = vld [vmem:[%s1571_s5 + $0x90] sm:$0xff]  ;;  %s1248_s27 = scalar_lea.hbm %s1247_s26, 1280  ;;  %p1253_p1 = scmp.lt.s32.totalorder %s1247_s26, %s1841_s3 }
  0x30   : > { %323 = vmatpush.msra.mxu0 %v254_v56  ;;  %436 = vmatpush.msra.mxu1 %v255_v57  ;;  %1027 = vst [vmem:[%s1606_s30 + $0xe8] sm:$0xff] %v1231_v63  ;;  %v233_v44 = vld [vmem:[%s1571_s5 + $0x98] sm:$0xff]  ;;  %v234_v53 = vld [vmem:[%s1571_s5 + $0xa0] sm:$0xff]  ;;  %p1249_p12 = scmp.ne.s32.totalorder %s1247_s26, %s1248_s27  ;;  %p1254_p2 = scmp.lt.s32.totalorder %s1252_s6, %s1248_s27 }
  0x31   : > { %550 = vmatpush.msra.mxu2 %v252_v54  ;;  %663 = vmatpush.msra.mxu3 %v253_v55  ;;  %1028 = vst [vmem:[%s1606_s30 + $0x110] sm:$0xff] %v1231_v63 }
  0x32   : > { %324 = vmatpush.msra.mxu0 %v250_v61  ;;  %437 = vmatpush.msra.mxu1 %v251_v62  ;;  %1029 = vst [vmem:[%s1606_s30 + $0x138] sm:$0xff] %v1231_v63  ;;  %v235_v62 = vld [vmem:[%s1571_s5 + $0xa8] sm:$0xff]  ;;  %p1250_p13 = pnand %p1249_p12, %p1374_p4  ;;  %p1255_p3 = por %p1254_p2, %p1253_p1 }
  0x33   : > { %551 = vmatpush.msra.mxu2 %v248_v58  ;;  %664 = vmatpush.msra.mxu3 %v249_v59  ;;  %1030 = vst [vmem:[%s1606_s30 + $0x160] sm:$0xff] %v1231_v63 }
  0x34   : > { %552 = vmatmul.f32.vlgmr.msra.gmra.mxu2 %v214_v60  ;;  %665 = vmatmul.f32.vlgmr.msra.gmra.mxu3 %v214_v60  ;;  %1031 = vst [vmem:[%s1606_s30 + $0x188] sm:$0xff] %v1231_v63  ;;  %p1251_p0 = pneg %p1250_p13 }
  0x35   : > { %325 = vmatpush.msra.mxu0 %v246_v0  ;;  %438 = vmatpush.msra.mxu1 %v247_v1  ;;  %1032 = vst [vmem:[%s1606_s30 + $0x1b0] sm:$0xff] %v1231_v63 }
  0x36   : > { %326 = vmatmul.f32.vlgmr.msra.gmra.mxu0 %v214_v60  ;;  %439 = vmatmul.f32.vlgmr.msra.gmra.mxu1 %v214_v60  ;;  %1033 = vst [vmem:[%s1606_s30 + $0x1d8] sm:$0xff] %v1231_v63  ;;  %p1256_p5 = pnand %p1255_p3, %p1251_p0 }
  0x37   : > { %1034 = vst [vmem:[%s1606_s30 + $0x200] sm:$0xff] %v1231_v63 }
  0x38   : > { %1035 = vst [vmem:[%s1606_s30 + $0x228] sm:$0xff] %v1231_v63 }
  0x39   : > { %1036 = vst [vmem:[%s1606_s30 + $0x250] sm:$0xff] %v1231_v63 }
  0x3a   : > { %1037 = vst [vmem:[%s1606_s30 + $0x278] sm:$0xff] %v1231_v63 }
  0x3b   : > { %1038 = vst [vmem:[%s1606_s30 + $0x2a0] sm:$0xff] %v1231_v63 }
  0x3c   : > { %555 = vmatmul.f32.gmra.mxu2 %v215_v2  ;;  %668 = vmatmul.f32.gmra.mxu3 %v215_v2  ;;  %1039 = vst [vmem:[%s1606_s30 + $0x2c8] sm:$0xff] %v1231_v63 }
  0x3d   : > { %1040 = vst [vmem:[%s1606_s30 + $0x2f0] sm:$0xff] %v1231_v63 }
  0x3e   : > { %329 = vmatmul.f32.gmra.mxu0 %v215_v2  ;;  %442 = vmatmul.f32.gmra.mxu1 %v215_v2  ;;  %1041 = vst [vmem:[%s1606_s30 + $0x318] sm:$0xff] %v1231_v63 }
  0x3f   : > { %1042 = vst [vmem:[%s1606_s30 + $0x340] sm:$0xff] %v1231_v63 }
  0x40   : > { %1043 = vst [vmem:[%s1606_s30 + $0x368] sm:$0xff] %v1231_v63 }
  0x41   : > { %1044 = vst [vmem:[%s1606_s30 + $0x390] sm:$0xff] %v1231_v63 }
  0x42   : > { %1045 = vst [vmem:[%s1606_s30 + $0x3b8] sm:$0xff] %v1231_v63 }
  0x43   : > { %1046 = vst [vmem:[%s1606_s30 + $0x3e0] sm:$0xff] %v1231_v63 }
  0x44   : > { %558 = vmatmul.f32.gmra.mxu2 %v216_v3  ;;  %671 = vmatmul.f32.gmra.mxu3 %v216_v3  ;;  %1047 = vst [vmem:[%s1606_s30 + $0x408] sm:$0xff] %v1231_v63 }
  0x45   : > { %1048 = vst [vmem:[%s1606_s30 + $0x430] sm:$0xff] %v1231_v63 }
  0x46   : > { %332 = vmatmul.f32.gmra.mxu0 %v216_v3  ;;  %445 = vmatmul.f32.gmra.mxu1 %v216_v3  ;;  %1049 = vst [vmem:[%s1606_s30 + $0x458] sm:$0xff] %v1231_v63 }
  0x47   : > { %1050 = vst [vmem:[%s1606_s30 + $0x480] sm:$0xff] %v1231_v63 }
  0x48   : > { %1051 = vst [vmem:[%s1606_s30 + $0x4a8] sm:$0xff] %v1231_v63 }
  0x49   : > { %1052 = vst [vmem:[%s1606_s30 + $0x4d0] sm:$0xff] %v1231_v63 }
  0x4a   : > { %1053 = vst [vmem:[%s1606_s30 + $0x4f8] sm:$0xff] %v1231_v63 }
  0x4c   : > { %561 = vmatmul.f32.gmra.mxu2 %v217_v4  ;;  %674 = vmatmul.f32.gmra.mxu3 %v217_v4 }
  0x4e   : > { %335 = vmatmul.f32.gmra.mxu0 %v217_v4  ;;  %448 = vmatmul.f32.gmra.mxu1 %v217_v4 }
  0x54   : > { %564 = vmatmul.f32.gmra.mxu2 %v218_v5  ;;  %677 = vmatmul.f32.gmra.mxu3 %v218_v5 }
  0x56   : > { %338 = vmatmul.f32.gmra.mxu0 %v218_v5  ;;  %451 = vmatmul.f32.gmra.mxu1 %v218_v5 }
  0x5c   : > { %567 = vmatmul.f32.gmra.mxu2 %v219_v6  ;;  %680 = vmatmul.f32.gmra.mxu3 %v219_v6 }
  0x5e   : > { %341 = vmatmul.f32.gmra.mxu0 %v219_v6  ;;  %454 = vmatmul.f32.gmra.mxu1 %v219_v6 }
  0x64   : > { %570 = vmatmul.f32.gmra.mxu2 %v220_v7  ;;  %683 = vmatmul.f32.gmra.mxu3 %v220_v7 }
  0x66   : > { %344 = vmatmul.f32.gmra.mxu0 %v220_v7  ;;  %457 = vmatmul.f32.gmra.mxu1 %v220_v7  ;;  %v236_v7 = vld [vmem:[%s1571_s5 + $0xb0] sm:$0xff] }
  0x6c   : > { %573 = vmatmul.f32.gmra.mxu2 %v221_v8  ;;  %686 = vmatmul.f32.gmra.mxu3 %v221_v8 }
  0x6e   : > { %347 = vmatmul.f32.gmra.mxu0 %v221_v8  ;;  %460 = vmatmul.f32.gmra.mxu1 %v221_v8 }
  0x74   : > { %576 = vmatmul.f32.gmra.mxu2 %v222_v9  ;;  %689 = vmatmul.f32.gmra.mxu3 %v222_v9 }
  0x76   : > { %350 = vmatmul.f32.gmra.mxu0 %v222_v9  ;;  %463 = vmatmul.f32.gmra.mxu1 %v222_v9 }
  0x7c   : > { %579 = vmatmul.f32.gmra.mxu2 %v223_v10  ;;  %692 = vmatmul.f32.gmra.mxu3 %v223_v10 }
  0x7e   : > { %353 = vmatmul.f32.gmra.mxu0 %v223_v10  ;;  %466 = vmatmul.f32.gmra.mxu1 %v223_v10 }
  0x84   : > { %582 = vmatmul.f32.gmra.mxu2 %v224_v11  ;;  %695 = vmatmul.f32.gmra.mxu3 %v224_v11 }
  0x86   : > { %356 = vmatmul.f32.gmra.mxu0 %v224_v11  ;;  %469 = vmatmul.f32.gmra.mxu1 %v224_v11 }
  0x8c   : > { %585 = vmatmul.f32.gmra.mxu2 %v225_v12  ;;  %698 = vmatmul.f32.gmra.mxu3 %v225_v12 }
  0x8e   : > { %359 = vmatmul.f32.gmra.mxu0 %v225_v12  ;;  %472 = vmatmul.f32.gmra.mxu1 %v225_v12 }
  0x94   : > { %588 = vmatmul.f32.gmra.mxu2 %v226_v13  ;;  %701 = vmatmul.f32.gmra.mxu3 %v226_v13 }
  0x96   : > { %362 = vmatmul.f32.gmra.mxu0 %v226_v13  ;;  %475 = vmatmul.f32.gmra.mxu1 %v226_v13 }
  0x9c   : > { %591 = vmatmul.f32.gmra.mxu2 %v227_v14  ;;  %704 = vmatmul.f32.gmra.mxu3 %v227_v14 }
  0x9e   : > { %365 = vmatmul.f32.gmra.mxu0 %v227_v14  ;;  %478 = vmatmul.f32.gmra.mxu1 %v227_v14 }
  0xa4   : > { %594 = vmatmul.f32.gmra.mxu2 %v228_v15  ;;  %707 = vmatmul.f32.gmra.mxu3 %v228_v15 }
  0xa6   : > { %368 = vmatmul.f32.gmra.mxu0 %v228_v15  ;;  %481 = vmatmul.f32.gmra.mxu1 %v228_v15 }
  0xac   : > { %597 = vmatmul.f32.gmra.mxu2 %v229_v16  ;;  %710 = vmatmul.f32.gmra.mxu3 %v229_v16 }
  0xae   : > { %371 = vmatmul.f32.gmra.mxu0 %v229_v16  ;;  %484 = vmatmul.f32.gmra.mxu1 %v229_v16  ;;  %v237_v16 = vld [vmem:[%s1571_s5 + $0xb8] sm:$0xff] }
  0xb3   : > { %v327_v18 = vpop.f32.mrf.mxu0  ;;  %v440_v19 = vpop.f32.mrf.mxu1 }
  0xb4   : > { %600 = vmatmul.f32.gmra.mxu2 %v230_v17  ;;  %713 = vmatmul.f32.gmra.mxu3 %v230_v17  ;;  %v762_v20 = vmax.f32 %v327_v18, 0.0  ;;  %v763_v21 = vmax.f32 %v440_v19, 0.0 }
  0xb6   : > { %890 = vst [vmem:[%s1606_s30] sm:$0xff] %v762_v20  ;;  %374 = vmatmul.f32.gmra.mxu0 %v230_v17  ;;  %487 = vmatmul.f32.gmra.mxu1 %v230_v17 }
  0xb7   : > { %v553_v22 = vpop.f32.mrf.mxu2  ;;  %v666_v23 = vpop.f32.mrf.mxu3  ;;  %891 = vst [vmem:[%s1606_s30 + $0x8] sm:$0xff] %v763_v21 }
  0xb8   : > { %v764_v24 = vmax.f32 %v553_v22, 0.0  ;;  %v765_v25 = vmax.f32 %v666_v23, 0.0 }
  0xba   : > { %892 = vst [vmem:[%s1606_s30 + $0x10] sm:$0xff] %v764_v24 }
  0xbb   : > { %893 = vst [vmem:[%s1606_s30 + $0x18] sm:$0xff] %v765_v25  ;;  %v330_v27 = vpop.f32.mrf.mxu0  ;;  %v443_v28 = vpop.f32.mrf.mxu1  ;;  %v238_v25 = vld [vmem:[%s1571_s5 + $0xc0] sm:$0xff] }
  0xbc   : > { %603 = vmatmul.f32.gmra.mxu2 %v231_v26  ;;  %716 = vmatmul.f32.gmra.mxu3 %v231_v26  ;;  %v766_v29 = vmax.f32 %v330_v27, 0.0  ;;  %v767_v30 = vmax.f32 %v443_v28, 0.0 }
  0xbe   : > { %894 = vst [vmem:[%s1606_s30 + $0x28] sm:$0xff] %v766_v29  ;;  %377 = vmatmul.f32.gmra.mxu0 %v231_v26  ;;  %490 = vmatmul.f32.gmra.mxu1 %v231_v26 }
  0xbf   : > { %v556_v31 = vpop.f32.mrf.mxu2  ;;  %v669_v32 = vpop.f32.mrf.mxu3  ;;  %895 = vst [vmem:[%s1606_s30 + $0x30] sm:$0xff] %v767_v30 }
  0xc0   : > { %v768_v33 = vmax.f32 %v556_v31, 0.0  ;;  %v769_v34 = vmax.f32 %v669_v32, 0.0 }
  0xc2   : > { %896 = vst [vmem:[%s1606_s30 + $0x38] sm:$0xff] %v768_v33 }
  0xc3   : > { %897 = vst [vmem:[%s1606_s30 + $0x40] sm:$0xff] %v769_v34  ;;  %v333_v36 = vpop.f32.mrf.mxu0  ;;  %v446_v37 = vpop.f32.mrf.mxu1  ;;  %v239_v34 = vld [vmem:[%s1571_s5 + $0xc8] sm:$0xff] }
  0xc4   : > { %606 = vmatmul.f32.gmra.mxu2 %v232_v35  ;;  %719 = vmatmul.f32.gmra.mxu3 %v232_v35  ;;  %v770_v38 = vmax.f32 %v333_v36, 0.0  ;;  %v771_v39 = vmax.f32 %v446_v37, 0.0 }
  0xc6   : > { %898 = vst [vmem:[%s1606_s30 + $0x50] sm:$0xff] %v770_v38  ;;  %380 = vmatmul.f32.gmra.mxu0 %v232_v35  ;;  %493 = vmatmul.f32.gmra.mxu1 %v232_v35 }
  0xc7   : > { %v559_v40 = vpop.f32.mrf.mxu2  ;;  %v672_v41 = vpop.f32.mrf.mxu3  ;;  %899 = vst [vmem:[%s1606_s30 + $0x58] sm:$0xff] %v771_v39 }
  0xc8   : > { %v772_v42 = vmax.f32 %v559_v40, 0.0  ;;  %v773_v43 = vmax.f32 %v672_v41, 0.0 }
  0xca   : > { %900 = vst [vmem:[%s1606_s30 + $0x60] sm:$0xff] %v772_v42 }
  0xcb   : > { %901 = vst [vmem:[%s1606_s30 + $0x68] sm:$0xff] %v773_v43  ;;  %v336_v45 = vpop.f32.mrf.mxu0  ;;  %v449_v46 = vpop.f32.mrf.mxu1  ;;  %v240_v43 = vld [vmem:[%s1571_s5 + $0xd0] sm:$0xff] }
  0xcc   : > { %609 = vmatmul.f32.gmra.mxu2 %v233_v44  ;;  %722 = vmatmul.f32.gmra.mxu3 %v233_v44  ;;  %v774_v47 = vmax.f32 %v336_v45, 0.0  ;;  %v775_v48 = vmax.f32 %v449_v46, 0.0 }
  0xce   : > { %902 = vst [vmem:[%s1606_s30 + $0x78] sm:$0xff] %v774_v47  ;;  %383 = vmatmul.f32.gmra.mxu0 %v233_v44  ;;  %496 = vmatmul.f32.gmra.mxu1 %v233_v44 }
  0xcf   : > { %v562_v49 = vpop.f32.mrf.mxu2  ;;  %v675_v50 = vpop.f32.mrf.mxu3  ;;  %903 = vst [vmem:[%s1606_s30 + $0x80] sm:$0xff] %v775_v48 }
  0xd0   : > { %v776_v51 = vmax.f32 %v562_v49, 0.0  ;;  %v777_v52 = vmax.f32 %v675_v50, 0.0 }
  0xd2   : > { %904 = vst [vmem:[%s1606_s30 + $0x88] sm:$0xff] %v776_v51 }
  0xd3   : > { %905 = vst [vmem:[%s1606_s30 + $0x90] sm:$0xff] %v777_v52  ;;  %v339_v54 = vpop.f32.mrf.mxu0  ;;  %v452_v55 = vpop.f32.mrf.mxu1  ;;  %v241_v52 = vld [vmem:[%s1571_s5 + $0xd8] sm:$0xff] }
  0xd4   : > { %612 = vmatmul.f32.gmra.mxu2 %v234_v53  ;;  %725 = vmatmul.f32.gmra.mxu3 %v234_v53  ;;  %v778_v56 = vmax.f32 %v339_v54, 0.0  ;;  %v779_v57 = vmax.f32 %v452_v55, 0.0 }
  0xd6   : > { %906 = vst [vmem:[%s1606_s30 + $0xa0] sm:$0xff] %v778_v56  ;;  %386 = vmatmul.f32.gmra.mxu0 %v234_v53  ;;  %499 = vmatmul.f32.gmra.mxu1 %v234_v53 }
  0xd7   : > { %v565_v58 = vpop.f32.mrf.mxu2  ;;  %v678_v59 = vpop.f32.mrf.mxu3  ;;  %907 = vst [vmem:[%s1606_s30 + $0xa8] sm:$0xff] %v779_v57 }
  0xd8   : > { %v780_v60 = vmax.f32 %v565_v58, 0.0  ;;  %v781_v61 = vmax.f32 %v678_v59, 0.0 }
  0xda   : > { %908 = vst [vmem:[%s1606_s30 + $0xb0] sm:$0xff] %v780_v60 }
  0xdb   : > { %909 = vst [vmem:[%s1606_s30 + $0xb8] sm:$0xff] %v781_v61  ;;  %v342_v63 = vpop.f32.mrf.mxu0  ;;  %v455_v0 = vpop.f32.mrf.mxu1  ;;  %v242_v61 = vld [vmem:[%s1571_s5 + $0xe0] sm:$0xff] }
  0xdc   : > { %615 = vmatmul.f32.gmra.mxu2 %v235_v62  ;;  %728 = vmatmul.f32.gmra.mxu3 %v235_v62  ;;  %v782_v1 = vmax.f32 %v342_v63, 0.0  ;;  %v783_v2 = vmax.f32 %v455_v0, 0.0 }
  0xde   : > { %910 = vst [vmem:[%s1606_s30 + $0xc8] sm:$0xff] %v782_v1  ;;  %389 = vmatmul.f32.gmra.mxu0 %v235_v62  ;;  %502 = vmatmul.f32.gmra.mxu1 %v235_v62 }
  0xdf   : > { %v568_v3 = vpop.f32.mrf.mxu2  ;;  %v681_v4 = vpop.f32.mrf.mxu3  ;;  %911 = vst [vmem:[%s1606_s30 + $0xd0] sm:$0xff] %v783_v2 }
  0xe0   : > { %v784_v5 = vmax.f32 %v568_v3, 0.0  ;;  %v785_v6 = vmax.f32 %v681_v4, 0.0 }
  0xe2   : > { %912 = vst [vmem:[%s1606_s30 + $0xd8] sm:$0xff] %v784_v5 }
  0xe3   : > { %913 = vst [vmem:[%s1606_s30 + $0xe0] sm:$0xff] %v785_v6  ;;  %v345_v8 = vpop.f32.mrf.mxu0  ;;  %v458_v9 = vpop.f32.mrf.mxu1  ;;  %v243_v6 = vld [vmem:[%s1571_s5 + $0xe8] sm:$0xff] }
  0xe4   : > { %618 = vmatmul.f32.gmra.mxu2 %v236_v7  ;;  %731 = vmatmul.f32.gmra.mxu3 %v236_v7  ;;  %v786_v10 = vmax.f32 %v345_v8, 0.0  ;;  %v787_v11 = vmax.f32 %v458_v9, 0.0 }
  0xe6   : > { %914 = vst [vmem:[%s1606_s30 + $0xf0] sm:$0xff] %v786_v10  ;;  %392 = vmatmul.f32.gmra.mxu0 %v236_v7  ;;  %505 = vmatmul.f32.gmra.mxu1 %v236_v7 }
  0xe7   : > { %v571_v12 = vpop.f32.mrf.mxu2  ;;  %v684_v13 = vpop.f32.mrf.mxu3  ;;  %915 = vst [vmem:[%s1606_s30 + $0xf8] sm:$0xff] %v787_v11 }
  0xe8   : > { %v788_v14 = vmax.f32 %v571_v12, 0.0  ;;  %v789_v15 = vmax.f32 %v684_v13, 0.0 }
  0xea   : > { %916 = vst [vmem:[%s1606_s30 + $0x100] sm:$0xff] %v788_v14 }
  0xeb   : > { %917 = vst [vmem:[%s1606_s30 + $0x108] sm:$0xff] %v789_v15  ;;  %v348_v17 = vpop.f32.mrf.mxu0  ;;  %v461_v18 = vpop.f32.mrf.mxu1  ;;  %v244_v15 = vld [vmem:[%s1571_s5 + $0xf0] sm:$0xff] }
  0xec   : > { %621 = vmatmul.f32.gmra.mxu2 %v237_v16  ;;  %734 = vmatmul.f32.gmra.mxu3 %v237_v16  ;;  %v790_v19 = vmax.f32 %v348_v17, 0.0  ;;  %v791_v20 = vmax.f32 %v461_v18, 0.0 }
  0xee   : > { %918 = vst [vmem:[%s1606_s30 + $0x118] sm:$0xff] %v790_v19  ;;  %395 = vmatmul.f32.gmra.mxu0 %v237_v16  ;;  %508 = vmatmul.f32.gmra.mxu1 %v237_v16 }
  0xef   : > { %v574_v21 = vpop.f32.mrf.mxu2  ;;  %v687_v22 = vpop.f32.mrf.mxu3  ;;  %919 = vst [vmem:[%s1606_s30 + $0x120] sm:$0xff] %v791_v20 }
  0xf0   : > { %v792_v23 = vmax.f32 %v574_v21, 0.0  ;;  %v793_v24 = vmax.f32 %v687_v22, 0.0 }
  0xf2   : > { %920 = vst [vmem:[%s1606_s30 + $0x128] sm:$0xff] %v792_v23 }
  0xf3   : > { %921 = vst [vmem:[%s1606_s30 + $0x130] sm:$0xff] %v793_v24  ;;  %v351_v26 = vpop.f32.mrf.mxu0  ;;  %v464_v27 = vpop.f32.mrf.mxu1  ;;  %v245_v24 = vld [vmem:[%s1571_s5 + $0xf8] sm:$0xff] }
  0xf4   : > { %624 = vmatmul.f32.gmra.mxu2 %v238_v25  ;;  %737 = vmatmul.f32.gmra.mxu3 %v238_v25  ;;  %v794_v28 = vmax.f32 %v351_v26, 0.0  ;;  %v795_v29 = vmax.f32 %v464_v27, 0.0 }
  0xf6   : > { %922 = vst [vmem:[%s1606_s30 + $0x140] sm:$0xff] %v794_v28  ;;  %398 = vmatmul.f32.gmra.mxu0 %v238_v25  ;;  %511 = vmatmul.f32.gmra.mxu1 %v238_v25 }
  0xf7   : > { %v577_v30 = vpop.f32.mrf.mxu2  ;;  %v690_v31 = vpop.f32.mrf.mxu3  ;;  %923 = vst [vmem:[%s1606_s30 + $0x148] sm:$0xff] %v795_v29 }
  0xf8   : > { %v796_v32 = vmax.f32 %v577_v30, 0.0  ;;  %v797_v33 = vmax.f32 %v690_v31, 0.0 }
  0xfa   : > { %924 = vst [vmem:[%s1606_s30 + $0x150] sm:$0xff] %v796_v32 }
  0xfb   : > { %925 = vst [vmem:[%s1606_s30 + $0x158] sm:$0xff] %v797_v33  ;;  %v354_v35 = vpop.f32.mrf.mxu0  ;;  %v467_v36 = vpop.f32.mrf.mxu1 }
  0xfc   : > { %627 = vmatmul.f32.gmra.mxu2 %v239_v34  ;;  %740 = vmatmul.f32.gmra.mxu3 %v239_v34  ;;  %v798_v37 = vmax.f32 %v354_v35, 0.0  ;;  %v799_v38 = vmax.f32 %v467_v36, 0.0 }
  0xfe   : > { %926 = vst [vmem:[%s1606_s30 + $0x168] sm:$0xff] %v798_v37  ;;  %401 = vmatmul.f32.gmra.mxu0 %v239_v34  ;;  %514 = vmatmul.f32.gmra.mxu1 %v239_v34 }
  0xff   : > { %v580_v39 = vpop.f32.mrf.mxu2  ;;  %v693_v40 = vpop.f32.mrf.mxu3  ;;  %927 = vst [vmem:[%s1606_s30 + $0x170] sm:$0xff] %v799_v38 }
 0x100   : > { %v800_v41 = vmax.f32 %v580_v39, 0.0  ;;  %v801_v42 = vmax.f32 %v693_v40, 0.0 }
 0x102   : > { %928 = vst [vmem:[%s1606_s30 + $0x178] sm:$0xff] %v800_v41 }
 0x103   : > { %929 = vst [vmem:[%s1606_s30 + $0x180] sm:$0xff] %v801_v42  ;;  %v357_v44 = vpop.f32.mrf.mxu0  ;;  %v470_v45 = vpop.f32.mrf.mxu1 }
 0x104   : > { %630 = vmatmul.f32.gmra.mxu2 %v240_v43  ;;  %743 = vmatmul.f32.gmra.mxu3 %v240_v43  ;;  %v802_v46 = vmax.f32 %v357_v44, 0.0  ;;  %v803_v47 = vmax.f32 %v470_v45, 0.0 }
 0x106   : > { %930 = vst [vmem:[%s1606_s30 + $0x190] sm:$0xff] %v802_v46  ;;  %404 = vmatmul.f32.gmra.mxu0 %v240_v43  ;;  %517 = vmatmul.f32.gmra.mxu1 %v240_v43 }
 0x107   : > { %v583_v48 = vpop.f32.mrf.mxu2  ;;  %v696_v49 = vpop.f32.mrf.mxu3  ;;  %931 = vst [vmem:[%s1606_s30 + $0x198] sm:$0xff] %v803_v47 }
 0x108   : > { %v804_v50 = vmax.f32 %v583_v48, 0.0  ;;  %v805_v51 = vmax.f32 %v696_v49, 0.0 }
 0x10a   : > { %932 = vst [vmem:[%s1606_s30 + $0x1a0] sm:$0xff] %v804_v50 }
 0x10b   : > { %933 = vst [vmem:[%s1606_s30 + $0x1a8] sm:$0xff] %v805_v51  ;;  %v360_v53 = vpop.f32.mrf.mxu0  ;;  %v473_v54 = vpop.f32.mrf.mxu1 }
 0x10c   : > { %633 = vmatmul.f32.gmra.mxu2 %v241_v52  ;;  %746 = vmatmul.f32.gmra.mxu3 %v241_v52  ;;  %v806_v55 = vmax.f32 %v360_v53, 0.0  ;;  %v807_v56 = vmax.f32 %v473_v54, 0.0 }
 0x10e   : > { %934 = vst [vmem:[%s1606_s30 + $0x1b8] sm:$0xff] %v806_v55  ;;  %407 = vmatmul.f32.gmra.mxu0 %v241_v52  ;;  %520 = vmatmul.f32.gmra.mxu1 %v241_v52 }
 0x10f   : > { %v586_v57 = vpop.f32.mrf.mxu2  ;;  %v699_v58 = vpop.f32.mrf.mxu3  ;;  %935 = vst [vmem:[%s1606_s30 + $0x1c0] sm:$0xff] %v807_v56 }
 0x110   : > { %v808_v59 = vmax.f32 %v586_v57, 0.0  ;;  %v809_v60 = vmax.f32 %v699_v58, 0.0 }
 0x112   : > { %936 = vst [vmem:[%s1606_s30 + $0x1c8] sm:$0xff] %v808_v59 }
 0x113   : > { %937 = vst [vmem:[%s1606_s30 + $0x1d0] sm:$0xff] %v809_v60  ;;  %v363_v62 = vpop.f32.mrf.mxu0  ;;  %v476_v63 = vpop.f32.mrf.mxu1 }
 0x114   : > { %636 = vmatmul.f32.gmra.mxu2 %v242_v61  ;;  %749 = vmatmul.f32.gmra.mxu3 %v242_v61  ;;  %v810_v0 = vmax.f32 %v363_v62, 0.0  ;;  %v811_v1 = vmax.f32 %v476_v63, 0.0 }
 0x116   : > { %938 = vst [vmem:[%s1606_s30 + $0x1e0] sm:$0xff] %v810_v0  ;;  %410 = vmatmul.f32.gmra.mxu0 %v242_v61  ;;  %523 = vmatmul.f32.gmra.mxu1 %v242_v61 }
 0x117   : > { %v589_v2 = vpop.f32.mrf.mxu2  ;;  %v702_v3 = vpop.f32.mrf.mxu3  ;;  %939 = vst [vmem:[%s1606_s30 + $0x1e8] sm:$0xff] %v811_v1 }
 0x118   : > { %v812_v4 = vmax.f32 %v589_v2, 0.0  ;;  %v813_v5 = vmax.f32 %v702_v3, 0.0 }
 0x11a   : > { %940 = vst [vmem:[%s1606_s30 + $0x1f0] sm:$0xff] %v812_v4 }
 0x11b   : > { %941 = vst [vmem:[%s1606_s30 + $0x1f8] sm:$0xff] %v813_v5  ;;  %v366_v7 = vpop.f32.mrf.mxu0  ;;  %v479_v8 = vpop.f32.mrf.mxu1 }
 0x11c   : > { %639 = vmatmul.f32.gmra.mxu2 %v243_v6  ;;  %752 = vmatmul.f32.gmra.mxu3 %v243_v6  ;;  %v814_v9 = vmax.f32 %v366_v7, 0.0  ;;  %v815_v10 = vmax.f32 %v479_v8, 0.0 }
 0x11e   : > { %942 = vst [vmem:[%s1606_s30 + $0x208] sm:$0xff] %v814_v9  ;;  %413 = vmatmul.f32.gmra.mxu0 %v243_v6  ;;  %526 = vmatmul.f32.gmra.mxu1 %v243_v6 }
 0x11f   : > { %v592_v11 = vpop.f32.mrf.mxu2  ;;  %v705_v12 = vpop.f32.mrf.mxu3  ;;  %943 = vst [vmem:[%s1606_s30 + $0x210] sm:$0xff] %v815_v10 }
 0x120   : > { %v816_v13 = vmax.f32 %v592_v11, 0.0  ;;  %v817_v14 = vmax.f32 %v705_v12, 0.0 }
 0x122   : > { %944 = vst [vmem:[%s1606_s30 + $0x218] sm:$0xff] %v816_v13 }
 0x123   : > { %945 = vst [vmem:[%s1606_s30 + $0x220] sm:$0xff] %v817_v14  ;;  %v369_v16 = vpop.f32.mrf.mxu0  ;;  %v482_v17 = vpop.f32.mrf.mxu1 }
 0x124   : > { %642 = vmatmul.f32.gmra.mxu2 %v244_v15  ;;  %755 = vmatmul.f32.gmra.mxu3 %v244_v15  ;;  %v818_v18 = vmax.f32 %v369_v16, 0.0  ;;  %v819_v19 = vmax.f32 %v482_v17, 0.0 }
 0x126   : > { %946 = vst [vmem:[%s1606_s30 + $0x230] sm:$0xff] %v818_v18  ;;  %416 = vmatmul.f32.gmra.mxu0 %v244_v15  ;;  %529 = vmatmul.f32.gmra.mxu1 %v244_v15 }
 0x127   : > { %v595_v20 = vpop.f32.mrf.mxu2  ;;  %v708_v21 = vpop.f32.mrf.mxu3  ;;  %947 = vst [vmem:[%s1606_s30 + $0x238] sm:$0xff] %v819_v19 }
 0x128   : > { %v820_v22 = vmax.f32 %v595_v20, 0.0  ;;  %v821_v23 = vmax.f32 %v708_v21, 0.0 }
 0x12a   : > { %948 = vst [vmem:[%s1606_s30 + $0x240] sm:$0xff] %v820_v22 }
 0x12b   : > { %949 = vst [vmem:[%s1606_s30 + $0x248] sm:$0xff] %v821_v23  ;;  %v372_v25 = vpop.f32.mrf.mxu0  ;;  %v485_v26 = vpop.f32.mrf.mxu1 }
 0x12c   : > { %645 = vmatmul.f32.gmra.mxu2 %v245_v24  ;;  %758 = vmatmul.f32.gmra.mxu3 %v245_v24  ;;  %v822_v27 = vmax.f32 %v372_v25, 0.0  ;;  %v823_v28 = vmax.f32 %v485_v26, 0.0 }
 0x12e   : > { %950 = vst [vmem:[%s1606_s30 + $0x258] sm:$0xff] %v822_v27  ;;  %419 = vmatmul.f32.gmra.mxu0 %v245_v24  ;;  %532 = vmatmul.f32.gmra.mxu1 %v245_v24 }
 0x12f   : > { %v598_v29 = vpop.f32.mrf.mxu2  ;;  %v711_v30 = vpop.f32.mrf.mxu3  ;;  %951 = vst [vmem:[%s1606_s30 + $0x260] sm:$0xff] %v823_v28 }
 0x130   : > { %v824_v31 = vmax.f32 %v598_v29, 0.0  ;;  %v825_v32 = vmax.f32 %v711_v30, 0.0 }
 0x132   : > { %952 = vst [vmem:[%s1606_s30 + $0x268] sm:$0xff] %v824_v31 }
 0x133   : > { %953 = vst [vmem:[%s1606_s30 + $0x270] sm:$0xff] %v825_v32  ;;  %v375_v33 = vpop.f32.mrf.mxu0  ;;  %v488_v34 = vpop.f32.mrf.mxu1 }
 0x134   : > { %v826_v35 = vmax.f32 %v375_v33, 0.0  ;;  %v827_v36 = vmax.f32 %v488_v34, 0.0 }
 0x136   : > { %954 = vst [vmem:[%s1606_s30 + $0x280] sm:$0xff] %v826_v35 }
 0x137   : > { %v601_v37 = vpop.f32.mrf.mxu2  ;;  %v714_v38 = vpop.f32.mrf.mxu3  ;;  %955 = vst [vmem:[%s1606_s30 + $0x288] sm:$0xff] %v827_v36 }
 0x138   : > { %v828_v39 = vmax.f32 %v601_v37, 0.0  ;;  %v829_v40 = vmax.f32 %v714_v38, 0.0 }
 0x13a   : > { %956 = vst [vmem:[%s1606_s30 + $0x290] sm:$0xff] %v828_v39 }
 0x13b   : > { %957 = vst [vmem:[%s1606_s30 + $0x298] sm:$0xff] %v829_v40  ;;  %v378_v41 = vpop.f32.mrf.mxu0  ;;  %v491_v42 = vpop.f32.mrf.mxu1 }
 0x13c   : > { %v830_v43 = vmax.f32 %v378_v41, 0.0  ;;  %v831_v44 = vmax.f32 %v491_v42, 0.0 }
 0x13e   : > { %958 = vst [vmem:[%s1606_s30 + $0x2a8] sm:$0xff] %v830_v43 }
 0x13f   : > { %v604_v45 = vpop.f32.mrf.mxu2  ;;  %v717_v46 = vpop.f32.mrf.mxu3  ;;  %959 = vst [vmem:[%s1606_s30 + $0x2b0] sm:$0xff] %v831_v44 }
 0x140   : > { %v832_v47 = vmax.f32 %v604_v45, 0.0  ;;  %v833_v48 = vmax.f32 %v717_v46, 0.0 }
 0x142   : > { %960 = vst [vmem:[%s1606_s30 + $0x2b8] sm:$0xff] %v832_v47 }
 0x143   : > { %961 = vst [vmem:[%s1606_s30 + $0x2c0] sm:$0xff] %v833_v48  ;;  %v381_v49 = vpop.f32.mrf.mxu0  ;;  %v494_v50 = vpop.f32.mrf.mxu1 }
 0x144   : > { %v834_v51 = vmax.f32 %v381_v49, 0.0  ;;  %v835_v52 = vmax.f32 %v494_v50, 0.0 }
 0x146   : > { %962 = vst [vmem:[%s1606_s30 + $0x2d0] sm:$0xff] %v834_v51 }
 0x147   : > { %v607_v53 = vpop.f32.mrf.mxu2  ;;  %v720_v54 = vpop.f32.mrf.mxu3  ;;  %963 = vst [vmem:[%s1606_s30 + $0x2d8] sm:$0xff] %v835_v52 }
 0x148   : > { %v836_v55 = vmax.f32 %v607_v53, 0.0  ;;  %v837_v56 = vmax.f32 %v720_v54, 0.0 }
 0x14a   : > { %964 = vst [vmem:[%s1606_s30 + $0x2e0] sm:$0xff] %v836_v55 }
 0x14b   : > { %965 = vst [vmem:[%s1606_s30 + $0x2e8] sm:$0xff] %v837_v56  ;;  %v384_v57 = vpop.f32.mrf.mxu0  ;;  %v497_v58 = vpop.f32.mrf.mxu1 }
 0x14c   : > { %v838_v59 = vmax.f32 %v384_v57, 0.0  ;;  %v839_v60 = vmax.f32 %v497_v58, 0.0 }
 0x14e   : > { %966 = vst [vmem:[%s1606_s30 + $0x2f8] sm:$0xff] %v838_v59 }
 0x14f   : > { %v610_v61 = vpop.f32.mrf.mxu2  ;;  %v723_v62 = vpop.f32.mrf.mxu3  ;;  %967 = vst [vmem:[%s1606_s30 + $0x300] sm:$0xff] %v839_v60 }
 0x150   : > { %v840_v63 = vmax.f32 %v610_v61, 0.0  ;;  %v841_v0 = vmax.f32 %v723_v62, 0.0 }
 0x152   : > { %968 = vst [vmem:[%s1606_s30 + $0x308] sm:$0xff] %v840_v63 }
 0x153   : > { %969 = vst [vmem:[%s1606_s30 + $0x310] sm:$0xff] %v841_v0  ;;  %v387_v1 = vpop.f32.mrf.mxu0  ;;  %v500_v2 = vpop.f32.mrf.mxu1 }
 0x154   : > { %v842_v3 = vmax.f32 %v387_v1, 0.0  ;;  %v843_v4 = vmax.f32 %v500_v2, 0.0 }
 0x156   : > { %970 = vst [vmem:[%s1606_s30 + $0x320] sm:$0xff] %v842_v3 }
 0x157   : > { %v613_v5 = vpop.f32.mrf.mxu2  ;;  %v726_v6 = vpop.f32.mrf.mxu3  ;;  %971 = vst [vmem:[%s1606_s30 + $0x328] sm:$0xff] %v843_v4 }
 0x158   : > { %v844_v7 = vmax.f32 %v613_v5, 0.0  ;;  %v845_v8 = vmax.f32 %v726_v6, 0.0 }
 0x15a   : > { %972 = vst [vmem:[%s1606_s30 + $0x330] sm:$0xff] %v844_v7 }
 0x15b   : > { %973 = vst [vmem:[%s1606_s30 + $0x338] sm:$0xff] %v845_v8  ;;  %v390_v9 = vpop.f32.mrf.mxu0  ;;  %v503_v10 = vpop.f32.mrf.mxu1 }
 0x15c   : > { %v846_v11 = vmax.f32 %v390_v9, 0.0  ;;  %v847_v12 = vmax.f32 %v503_v10, 0.0 }
 0x15e   : > { %974 = vst [vmem:[%s1606_s30 + $0x348] sm:$0xff] %v846_v11 }
 0x15f   : > { %v616_v13 = vpop.f32.mrf.mxu2  ;;  %v729_v14 = vpop.f32.mrf.mxu3  ;;  %975 = vst [vmem:[%s1606_s30 + $0x350] sm:$0xff] %v847_v12 }
 0x160   : > { %v848_v15 = vmax.f32 %v616_v13, 0.0  ;;  %v849_v16 = vmax.f32 %v729_v14, 0.0 }
 0x162   : > { %976 = vst [vmem:[%s1606_s30 + $0x358] sm:$0xff] %v848_v15 }
 0x163   : > { %977 = vst [vmem:[%s1606_s30 + $0x360] sm:$0xff] %v849_v16  ;;  %v393_v17 = vpop.f32.mrf.mxu0  ;;  %v506_v18 = vpop.f32.mrf.mxu1 }
 0x164   : > { %v850_v19 = vmax.f32 %v393_v17, 0.0  ;;  %v851_v20 = vmax.f32 %v506_v18, 0.0 }
 0x166   : > { %978 = vst [vmem:[%s1606_s30 + $0x370] sm:$0xff] %v850_v19 }
 0x167   : > { %v619_v21 = vpop.f32.mrf.mxu2  ;;  %v732_v22 = vpop.f32.mrf.mxu3  ;;  %979 = vst [vmem:[%s1606_s30 + $0x378] sm:$0xff] %v851_v20 }
 0x168   : > { %v852_v23 = vmax.f32 %v619_v21, 0.0  ;;  %v853_v24 = vmax.f32 %v732_v22, 0.0 }
 0x16a   : > { %980 = vst [vmem:[%s1606_s30 + $0x380] sm:$0xff] %v852_v23 }
 0x16b   : > { %981 = vst [vmem:[%s1606_s30 + $0x388] sm:$0xff] %v853_v24  ;;  %v396_v25 = vpop.f32.mrf.mxu0  ;;  %v509_v26 = vpop.f32.mrf.mxu1 }
 0x16c   : > { %v854_v27 = vmax.f32 %v396_v25, 0.0  ;;  %v855_v28 = vmax.f32 %v509_v26, 0.0 }
 0x16e   : > { %982 = vst [vmem:[%s1606_s30 + $0x398] sm:$0xff] %v854_v27 }
 0x16f   : > { %v622_v29 = vpop.f32.mrf.mxu2  ;;  %v735_v30 = vpop.f32.mrf.mxu3  ;;  %983 = vst [vmem:[%s1606_s30 + $0x3a0] sm:$0xff] %v855_v28 }
 0x170   : > { %v856_v31 = vmax.f32 %v622_v29, 0.0  ;;  %v857_v32 = vmax.f32 %v735_v30, 0.0 }
 0x172   : > { %984 = vst [vmem:[%s1606_s30 + $0x3a8] sm:$0xff] %v856_v31 }
 0x173   : > { %985 = vst [vmem:[%s1606_s30 + $0x3b0] sm:$0xff] %v857_v32  ;;  %v399_v33 = vpop.f32.mrf.mxu0  ;;  %v512_v34 = vpop.f32.mrf.mxu1 }
 0x174   : > { %v858_v35 = vmax.f32 %v399_v33, 0.0  ;;  %v859_v36 = vmax.f32 %v512_v34, 0.0 }
 0x176   : > { %986 = vst [vmem:[%s1606_s30 + $0x3c0] sm:$0xff] %v858_v35 }
 0x177   : > { %v625_v37 = vpop.f32.mrf.mxu2  ;;  %v738_v38 = vpop.f32.mrf.mxu3  ;;  %987 = vst [vmem:[%s1606_s30 + $0x3c8] sm:$0xff] %v859_v36 }
 0x178   : > { %v860_v39 = vmax.f32 %v625_v37, 0.0  ;;  %v861_v40 = vmax.f32 %v738_v38, 0.0 }
 0x17a   : > { %988 = vst [vmem:[%s1606_s30 + $0x3d0] sm:$0xff] %v860_v39 }
 0x17b   : > { %989 = vst [vmem:[%s1606_s30 + $0x3d8] sm:$0xff] %v861_v40  ;;  %v402_v41 = vpop.f32.mrf.mxu0  ;;  %v515_v42 = vpop.f32.mrf.mxu1 }
 0x17c   : > { %v862_v43 = vmax.f32 %v402_v41, 0.0  ;;  %v863_v44 = vmax.f32 %v515_v42, 0.0 }
 0x17e   : > { %990 = vst [vmem:[%s1606_s30 + $0x3e8] sm:$0xff] %v862_v43 }
 0x17f   : > { %v628_v45 = vpop.f32.mrf.mxu2  ;;  %v741_v46 = vpop.f32.mrf.mxu3  ;;  %991 = vst [vmem:[%s1606_s30 + $0x3f0] sm:$0xff] %v863_v44 }
 0x180   : > { %v864_v47 = vmax.f32 %v628_v45, 0.0  ;;  %v865_v48 = vmax.f32 %v741_v46, 0.0 }
 0x182   : > { %992 = vst [vmem:[%s1606_s30 + $0x3f8] sm:$0xff] %v864_v47 }
 0x183   : > { %993 = vst [vmem:[%s1606_s30 + $0x400] sm:$0xff] %v865_v48  ;;  %v405_v49 = vpop.f32.mrf.mxu0  ;;  %v518_v50 = vpop.f32.mrf.mxu1 }
 0x184   : > { %v866_v51 = vmax.f32 %v405_v49, 0.0  ;;  %v867_v52 = vmax.f32 %v518_v50, 0.0 }
 0x186   : > { %994 = vst [vmem:[%s1606_s30 + $0x410] sm:$0xff] %v866_v51 }
 0x187   : > { %v631_v53 = vpop.f32.mrf.mxu2  ;;  %v744_v54 = vpop.f32.mrf.mxu3  ;;  %995 = vst [vmem:[%s1606_s30 + $0x418] sm:$0xff] %v867_v52 }
 0x188   : > { %v868_v55 = vmax.f32 %v631_v53, 0.0  ;;  %v869_v56 = vmax.f32 %v744_v54, 0.0 }
 0x18a   : > { %996 = vst [vmem:[%s1606_s30 + $0x420] sm:$0xff] %v868_v55 }
 0x18b   : > { %997 = vst [vmem:[%s1606_s30 + $0x428] sm:$0xff] %v869_v56  ;;  %v408_v57 = vpop.f32.mrf.mxu0  ;;  %v521_v58 = vpop.f32.mrf.mxu1 }
 0x18c   : > { %v870_v59 = vmax.f32 %v408_v57, 0.0  ;;  %v871_v60 = vmax.f32 %v521_v58, 0.0 }
 0x18e   : > { %998 = vst [vmem:[%s1606_s30 + $0x438] sm:$0xff] %v870_v59 }
 0x18f   : > { %v634_v61 = vpop.f32.mrf.mxu2  ;;  %v747_v62 = vpop.f32.mrf.mxu3  ;;  %999 = vst [vmem:[%s1606_s30 + $0x440] sm:$0xff] %v871_v60 }
 0x190   : > { %v872_v63 = vmax.f32 %v634_v61, 0.0  ;;  %v873_v0 = vmax.f32 %v747_v62, 0.0 }
 0x192   : > { %1000 = vst [vmem:[%s1606_s30 + $0x448] sm:$0xff] %v872_v63 }
 0x193   : > { %1001 = vst [vmem:[%s1606_s30 + $0x450] sm:$0xff] %v873_v0  ;;  %v411_v1 = vpop.f32.mrf.mxu0  ;;  %v524_v2 = vpop.f32.mrf.mxu1 }
 0x194   : > { %v874_v3 = vmax.f32 %v411_v1, 0.0  ;;  %v875_v4 = vmax.f32 %v524_v2, 0.0 }
 0x196   : > { %1002 = vst [vmem:[%s1606_s30 + $0x460] sm:$0xff] %v874_v3 }
 0x197   : > { %v637_v5 = vpop.f32.mrf.mxu2  ;;  %v750_v6 = vpop.f32.mrf.mxu3  ;;  %1003 = vst [vmem:[%s1606_s30 + $0x468] sm:$0xff] %v875_v4 }
 0x198   : > { %v876_v7 = vmax.f32 %v637_v5, 0.0  ;;  %v877_v8 = vmax.f32 %v750_v6, 0.0 }
 0x19a   : > { %1004 = vst [vmem:[%s1606_s30 + $0x470] sm:$0xff] %v876_v7 }
 0x19b   : > { %1005 = vst [vmem:[%s1606_s30 + $0x478] sm:$0xff] %v877_v8  ;;  %v414_v9 = vpop.f32.mrf.mxu0  ;;  %v527_v10 = vpop.f32.mrf.mxu1 }
 0x19c   : > { %v878_v11 = vmax.f32 %v414_v9, 0.0  ;;  %v879_v12 = vmax.f32 %v527_v10, 0.0 }
 0x19e   : > { %1006 = vst [vmem:[%s1606_s30 + $0x488] sm:$0xff] %v878_v11 }
 0x19f   : > { %v640_v13 = vpop.f32.mrf.mxu2  ;;  %v753_v14 = vpop.f32.mrf.mxu3  ;;  %1007 = vst [vmem:[%s1606_s30 + $0x490] sm:$0xff] %v879_v12 }
 0x1a0   : > { %v880_v15 = vmax.f32 %v640_v13, 0.0  ;;  %v881_v16 = vmax.f32 %v753_v14, 0.0 }
 0x1a2   : > { %1008 = vst [vmem:[%s1606_s30 + $0x498] sm:$0xff] %v880_v15 }
 0x1a3   : > { %1009 = vst [vmem:[%s1606_s30 + $0x4a0] sm:$0xff] %v881_v16  ;;  %v417_v17 = vpop.f32.mrf.mxu0  ;;  %v530_v18 = vpop.f32.mrf.mxu1 }
 0x1a4   : > { %v882_v19 = vmax.f32 %v417_v17, 0.0  ;;  %v883_v20 = vmax.f32 %v530_v18, 0.0 }
 0x1a6   : > { %1010 = vst [vmem:[%s1606_s30 + $0x4b0] sm:$0xff] %v882_v19 }
 0x1a7   : > { %v643_v21 = vpop.f32.mrf.mxu2  ;;  %v756_v22 = vpop.f32.mrf.mxu3  ;;  %1011 = vst [vmem:[%s1606_s30 + $0x4b8] sm:$0xff] %v883_v20 }
 0x1a8   : > { %v884_v23 = vmax.f32 %v643_v21, 0.0  ;;  %v885_v24 = vmax.f32 %v756_v22, 0.0 }
 0x1aa   : > { %1012 = vst [vmem:[%s1606_s30 + $0x4c0] sm:$0xff] %v884_v23 }
 0x1ab   : > { %1013 = vst [vmem:[%s1606_s30 + $0x4c8] sm:$0xff] %v885_v24  ;;  %v420_v25 = vpop.f32.mrf.mxu0  ;;  %v533_v26 = vpop.f32.mrf.mxu1 }
 0x1ac   : > { %v886_v27 = vmax.f32 %v420_v25, 0.0  ;;  %v887_v28 = vmax.f32 %v533_v26, 0.0 }
 0x1ae   : > { %1014 = vst [vmem:[%s1606_s30 + $0x4d8] sm:$0xff] %v886_v27 }
 0x1af   : > { %v646_v29 = vpop.f32.mrf.mxu2  ;;  %v759_v30 = vpop.f32.mrf.mxu3  ;;  %1015 = vst [vmem:[%s1606_s30 + $0x4e0] sm:$0xff] %v887_v28 }
 0x1b0   : > { %v888_v31 = vmax.f32 %v646_v29, 0.0  ;;  %v889_v32 = vmax.f32 %v759_v30, 0.0 }
 0x1b2   : > { %1016 = vst [vmem:[%s1606_s30 + $0x4e8] sm:$0xff] %v888_v31 }
 0x1b3   : > { %1017 = vst [vmem:[%s1606_s30 + $0x4f0] sm:$0xff] %v889_v32 }
 0x1b4   : > { %1259 = shalt.err (!%p1256_p5)
}
 0x1b5   : > { %s1312_s9 = smov 640   ;;  %s1313_s10 = smov 40  }
 0x1b6   : > { %1174 = dma.vmem_to_hbm [thread:$0]  (%p1374_p4), %s1071_s15, 20480, %s1073_s19, %s1055_s23, %s1312_s9, %s1312_s9, %s1313_s10  }
 0x1b7 PF: > { %p1180_p6 = scmp.ge.s32.totalorder %s1310_s17, 2  ;;  %s1087_s11 = sand.u32 1, %s1290_s12  }
 0x1b8   : > { %s1088_s30 = scalar_lea.sflag [#allocation3], %s1087_s11 }
 0x1b9   : > { %p1177_p7 = pnand %p1180_p6, %p1381_p8 }
 0x1bb   : > { %p1178_p9 = pneg %p1177_p7 }
 0x1bd   : > { %1285 = dma.done.wait (%p1178_p9), %s1088_s30, 20480  }
 0x1be   : > { %1287 = vsyncadd (%p1178_p9), %s1088_s30, 4294946816  ;;  %s16_s17 = sadd.s32 1, %s1310_s17   ;;  %s1844_s12 = smov %s1294_s13 }
 0x1bf   : > { %p13_p10 = scmp.ge.s32.totalorder %s16_s17, 4   ;;  %s1845_s13 = smov %s1298_s14 }
 0x1c0   : > { %s1846_s14 = smov %s1387_s25  ;;  %s1847_s15 = smov %s1306_s16 }
 0x1c1   : > { %s1848_s16 = smov %s1850_s20  ;;  %15 = sbr.rel (!%p13_p10) target bundleno = 4 (0x4), region = 70 }
 0x1c6   :  { %1094 = vsyncpa [#allocation3], 1 }
 0x1c7   :  { %1096 = vsyncpa [#allocation3 + $0x1], 1 }

</bundles_post_ra>
